<compile_context>
chip_gen: v5e
topology: v5e:2x2
jax: 0.10.0
libtpu: 0.0.40
codegen_flags: <defaults>
</compile_context>

<pallas_src>
import functools

import jax
import jax.numpy as jnp
from jax.experimental import pallas as pl
from jax.experimental.pallas import tpu as pltpu

LN_EPS = 1e-5
_LANE = 128
_TB_ALIGN = 16          # batch-tile granularity (bf16 sublane packing = 16)
_OUT_PAD = 128          # lane-dense output slab: q1 -> col 0, q2 -> col 1
_TK_MAX = 2048          # trunk K-tile (multiple of 128, per perf review)
_TW_RESIDENT_BYTES = 16 * 1024 * 1024   # keep trunk weight VMEM-resident below this


def _round_up(x, m):
    return ((x + m - 1) // m) * m


def _critic_kernel(feature_dim, tk, tw_resident,
                   obs_ref, act_ref,
                   tw_ref, tb_ref, g_ref, beta_ref,
                   w1h_ref, w1a_ref, b1_ref,
                   w2a_ref, b2a_ref, w2b_ref, b2b_ref,
                   w3_ref, b3_ref,
                   out_ref, acc_ref):
    k = pl.program_id(1)

    @pl.when(k == 0)
    def _():
        acc_ref[...] = jnp.zeros_like(acc_ref)

    # Trunk matmul, K-tiled over repr_dim (bf16 operands, f32 MXU accumulate).
    # When the trunk weight is VMEM-resident (constant index map, DMA'd once),
    # slice the current K-tile out of it; otherwise the BlockSpec streams the
    # (TK, F_pad) tile for us.
    if tw_resident:
        start = pl.multiple_of(k * tk, tk)
        w_tile = tw_ref[pl.ds(start, tk), :]
    else:
        w_tile = tw_ref[...]
    acc_ref[...] += jnp.dot(obs_ref[...], w_tile,
                            preferred_element_type=jnp.float32)

    @pl.when(k == pl.num_programs(1) - 1)
    def _():
        f_pad = acc_ref.shape[-1]
        h_pad = w2a_ref.shape[0]
        inv_n = 1.0 / float(feature_dim)

        h = acc_ref[...] + tb_ref[...]

        # LayerNorm over the *true* feature_dim columns. Padded columns of h
        # are exactly zero (zero weight cols + zero bias), so the plain sum is
        # already the true-column sum; the variance needs explicit masking.
        col = jax.lax.broadcasted_iota(jnp.int32, (1, f_pad), 1)
        mask = (col < feature_dim).astype(jnp.float32)
        mu = jnp.sum(h, axis=-1, keepdims=True) * inv_n
        c = (h - mu) * mask
        var = jnp.sum(c * c, axis=-1, keepdims=True) * inv_n
        hn = c * jax.lax.rsqrt(var + LN_EPS)
        hb = jnp.tanh(hn * g_ref[...] + beta_ref[...]).astype(jnp.bfloat16)

        # Q heads, layer 1 fused across both heads:
        # cat([h, act]) @ W1 == h @ W1_h + act @ W1_a, with N = 2*H_pad.
        z = (jnp.dot(hb, w1h_ref[...], preferred_element_type=jnp.float32)
             + jnp.dot(act_ref[...], w1a_ref[...],
                       preferred_element_type=jnp.float32)
             + b1_ref[...])
        z = jnp.maximum(z, 0.0).astype(jnp.bfloat16)

        # Layer 2 per head on 128-aligned lane slices of z.
        z1 = z[:, :h_pad]
        z2 = z[:, h_pad:]
        y1 = jnp.maximum(
            jnp.dot(z1, w2a_ref[...], preferred_element_type=jnp.float32)
            + b2a_ref[...], 0.0).astype(jnp.bfloat16)
        y2 = jnp.maximum(
            jnp.dot(z2, w2b_ref[...], preferred_element_type=jnp.float32)
            + b2b_ref[...], 0.0).astype(jnp.bfloat16)

        # Layer 3: ONE fused (TB, 2H) x (2H, 128) matmul; lane-dense output
        # slab with q1 in col 0 and q2 in col 1, full-width unmasked stores.
        y = jnp.concatenate([y1, y2], axis=-1)
        out_ref[...] = (
            jnp.dot(y, w3_ref[...], preferred_element_type=jnp.float32)
            + b3_ref[...])


def init_params(key, repr_dim, action_dim, feature_dim, hidden_dim):
    """Raw (unpadded, per-head) f32 params matching the PyTorch module.
    Linear weights stored as (in, out) so y = x @ W + b."""
    ks = jax.random.split(key, 20)

    def lin(kw, kb, fan_in, fan_out):
        s = 1.0 / jnp.sqrt(jnp.float32(fan_in))
        w = jax.random.uniform(kw, (fan_in, fan_out), jnp.float32, -s, s)
        b = jax.random.uniform(kb, (1, fan_out), jnp.float32, -s, s)
        return w, b

    p = {}
    p["trunk_w"], p["trunk_b"] = lin(ks[0], ks[1], repr_dim, feature_dim)
    p["ln_g"] = 1.0 + 0.1 * jax.random.normal(ks[2], (1, feature_dim), jnp.float32)
    p["ln_b"] = 0.1 * jax.random.normal(ks[3], (1, feature_dim), jnp.float32)

    for name, o in (("q1", 4), ("q2", 11)):
        w1, b1 = lin(ks[o], ks[o + 1], feature_dim + action_dim, hidden_dim)
        p[f"{name}_w1h"] = w1[:feature_dim]
        p[f"{name}_w1a"] = w1[feature_dim:]
        p[f"{name}_b1"] = b1
        p[f"{name}_w2"], p[f"{name}_b2"] = lin(ks[o + 2], ks[o + 3],
                                               hidden_dim, hidden_dim)
        p[f"{name}_w3"], p[f"{name}_b3"] = lin(ks[o + 4], ks[o + 5],
                                               hidden_dim, 1)
    return p


def pack_params(params, repr_dim, action_dim, feature_dim, hidden_dim):
    """Zero-pad to lane-aligned shapes, fuse the two Q heads, store matmul
    weights in bf16 (biases / LayerNorm params stay f32)."""
    TK = min(_TK_MAX, _round_up(repr_dim, _LANE))   # trunk K-tile
    R_pad = _round_up(repr_dim, TK)
    A_pad = _round_up(action_dim, _LANE)
    F_pad = _round_up(feature_dim, _LANE)
    H_pad = _round_up(hidden_dim, _LANE)
    # Keep the full trunk weight VMEM-resident (single copy) when it fits.
    tw_resident = (R_pad * F_pad * 2) <= _TW_RESIDENT_BYTES

    def pad2(w, r, c):
        return jnp.zeros((r, c), jnp.float32).at[:w.shape[0], :w.shape[1]].set(w)

    p = {}
    p["tw"] = pad2(params["trunk_w"], R_pad, F_pad).astype(jnp.bfloat16)
    p["tb"] = pad2(params["trunk_b"], 1, F_pad)
    p["g"] = pad2(params["ln_g"], 1, F_pad)
    p["beta"] = pad2(params["ln_b"], 1, F_pad)

    # layer 1: fused across heads, N = 2*H_pad (q1 in cols [0,H_pad), q2 after)
    w1h = jnp.zeros((F_pad, 2 * H_pad), jnp.float32)
    w1h = w1h.at[:feature_dim, :hidden_dim].set(params["q1_w1h"])
    w1h = w1h.at[:feature_dim, H_pad:H_pad + hidden_dim].set(params["q2_w1h"])
    w1a = jnp.zeros((A_pad, 2 * H_pad), jnp.float32)
    w1a = w1a.at[:action_dim, :hidden_dim].set(params["q1_w1a"])
    w1a = w1a.at[:action_dim, H_pad:H_pad + hidden_dim].set(params["q2_w1a"])
    b1 = jnp.zeros((1, 2 * H_pad), jnp.float32)
    b1 = b1.at[:, :hidden_dim].set(params["q1_b1"])
    b1 = b1.at[:, H_pad:H_pad + hidden_dim].set(params["q2_b1"])
    p["w1h"] = w1h.astype(jnp.bfloat16)
    p["w1a"] = w1a.astype(jnp.bfloat16)
    p["b1"] = b1

    # layer 2: per head (block-diagonal fusion would double the MACs with zeros)
    p["w2a"] = pad2(params["q1_w2"], H_pad, H_pad).astype(jnp.bfloat16)
    p["b2a"] = pad2(params["q1_b2"], 1, H_pad)
    p["w2b"] = pad2(params["q2_w2"], H_pad, H_pad).astype(jnp.bfloat16)
    p["b2b"] = pad2(params["q2_b2"], 1, H_pad)

    # layer 3: single fused (2*H_pad, 128) weight; q1 rows -> col 0, q2 -> col 1
    w3 = jnp.zeros((2 * H_pad, _OUT_PAD), jnp.float32)
    w3 = w3.at[:hidden_dim, 0:1].set(params["q1_w3"])
    w3 = w3.at[H_pad:H_pad + hidden_dim, 1:2].set(params["q2_w3"])
    b3 = jnp.zeros((1, _OUT_PAD), jnp.float32)
    b3 = b3.at[:, 0:1].set(params["q1_b3"])
    b3 = b3.at[:, 1:2].set(params["q2_b3"])
    p["w3"] = w3.astype(jnp.bfloat16)
    p["b3"] = b3

    p["dims"] = dict(repr_dim=repr_dim, action_dim=action_dim,
                     feature_dim=feature_dim, hidden_dim=hidden_dim,
                     R_pad=R_pad, A_pad=A_pad, F_pad=F_pad, H_pad=H_pad,
                     TK=TK, tw_resident=tw_resident)
    return p


def critic_forward(obs, action, packed):
    """obs: (B, repr_dim), action: (B, action_dim) -> (q1, q2), each (B, 1)."""
    d = packed["dims"]
    B = obs.shape[0]
    TK = d["TK"]
    R_pad, A_pad, F_pad, H_pad = d["R_pad"], d["A_pad"], d["F_pad"], d["H_pad"]
    tw_resident = d["tw_resident"]

    # Batch tiling: when the trunk weight is streamed, use a bigger tile so the
    # weight is re-fetched fewer times; otherwise cap at 256.  Always try to
    # get nb >= 2 (tile >= 128) so the "parallel" axis shards across both v7x
    # TensorCores.
    tb_cap = 256 if tw_resident else 512
    B_al = _round_up(B, _TB_ALIGN)
    nb = max(1, -(-B_al // tb_cap))
    if nb == 1 and B_al >= 256:
        nb = 2
    TB = _round_up(-(-B_al // nb), _TB_ALIGN)
    B_pad = nb * TB
    nk = R_pad // TK

    # Pad + cast inputs only when needed.  In production the encoder should
    # emit (B_pad, R_pad) bf16 directly so this extra HBM pass disappears.
    if obs.shape == (B_pad, R_pad) and obs.dtype == jnp.bfloat16:
        obs_p = obs
    else:
        obs_p = jnp.zeros((B_pad, R_pad), jnp.bfloat16)
        obs_p = obs_p.at[:B, :d["repr_dim"]].set(obs.astype(jnp.bfloat16))
    if action.shape == (B_pad, A_pad) and action.dtype == jnp.bfloat16:
        act_p = action
    else:
        act_p = jnp.zeros((B_pad, A_pad), jnp.bfloat16)
        act_p = act_p.at[:B, :d["action_dim"]].set(action.astype(jnp.bfloat16))

    def const(shape):
        # Constant index map -> DMA'd exactly once; single buffer saves VMEM.
        return pl.BlockSpec(shape, lambda i, k: (0, 0),
                            pipeline_mode=pl.Buffered(1))

    if tw_resident:
        tw_spec = const((R_pad, F_pad))                       # whole weight resident
    else:
        tw_spec = pl.BlockSpec((TK, F_pad), lambda i, k: (k, 0))  # streamed K-tiles

    in_specs = [
        pl.BlockSpec((TB, TK), lambda i, k: (i, k)),          # obs (batch x K tile)
        pl.BlockSpec((TB, A_pad), lambda i, k: (i, 0)),       # action (batch tile)
        tw_spec,                                              # trunk weight
        const((1, F_pad)),                                    # trunk bias
        const((1, F_pad)),                                    # ln gamma
        const((1, F_pad)),                                    # ln beta
        const((F_pad, 2 * H_pad)),                            # w1h fused
        const((A_pad, 2 * H_pad)),                            # w1a fused
        const((1, 2 * H_pad)),                                # b1 fused
        const((H_pad, H_pad)), const((1, H_pad)),             # q1 w2 / b2
        const((H_pad, H_pad)), const((1, H_pad)),             # q2 w2 / b2
        const((2 * H_pad, _OUT_PAD)),                         # w3 fused
        const((1, _OUT_PAD)),                                 # b3
    ]

    # VMEM budget: actual block bytes (+ epilogue temporaries + headroom),
    # capped at 48 MiB so it stays well inside a v7x TensorCore's 64 MiB.
    bf16, f32 = 2, 4
    blocks = (
        2 * TB * TK * bf16                                    # obs (2 buffers)
        + 2 * TB * A_pad * bf16                               # action (2 buffers)
        + (R_pad * F_pad * bf16 if tw_resident
           else 2 * TK * F_pad * bf16)                        # trunk weight
        + 3 * F_pad * f32                                     # trunk bias, gamma, beta
        + (F_pad + A_pad) * 2 * H_pad * bf16                  # w1h + w1a
        + 2 * H_pad * f32                                     # b1
        + 2 * H_pad * H_pad * bf16                            # w2a + w2b
        + 2 * (H_pad * f32)                                   # b2a + b2b
        + 2 * H_pad * _OUT_PAD * bf16                         # w3
        + _OUT_PAD * f32                                      # b3
        + 2 * TB * _OUT_PAD * f32                             # out (2 buffers)
        + TB * F_pad * f32                                    # trunk accumulator
    )
    epilogue = TB * 2 * H_pad * 8 + TB * F_pad * 8            # live f32/bf16 temps
    vmem_limit = int(1.25 * (blocks + epilogue)) + (2 << 20)
    vmem_limit = max(32 << 20, min(vmem_limit, 48 << 20))

    grid_spec = pltpu.PrefetchScalarGridSpec(
        num_scalar_prefetch=0,
        grid=(nb, nk),
        in_specs=in_specs,
        out_specs=pl.BlockSpec((TB, _OUT_PAD), lambda i, k: (i, 0)),
        scratch_shapes=[pltpu.VMEM((TB, F_pad), jnp.float32)],  # trunk accumulator
    )

    out = pl.pallas_call(
        functools.partial(_critic_kernel, d["feature_dim"], TK, tw_resident),
        out_shape=jax.ShapeDtypeStruct((B_pad, _OUT_PAD), jnp.float32),
        grid_spec=grid_spec,
        compiler_params=pltpu.CompilerParams(
            dimension_semantics=("parallel", "arbitrary"),
            vmem_limit_bytes=vmem_limit),
    )(obs_p, act_p,
      packed["tw"], packed["tb"], packed["g"], packed["beta"],
      packed["w1h"], packed["w1a"], packed["b1"],
      packed["w2a"], packed["b2a"], packed["w2b"], packed["b2b"],
      packed["w3"], packed["b3"])

    return out[:B, 0:1], out[:B, 1:2]


def critic_ref(obs, action, params):
    """Pure-JAX reference mirroring the kernel's mixed-precision strategy
    (bf16 matmul operands, f32 accumulation / LayerNorm / biases)."""
    bf16 = jnp.bfloat16

    def mm(x, w):
        return jnp.dot(x.astype(bf16), w.astype(bf16),
                       preferred_element_type=jnp.float32)

    h = mm(obs, params["trunk_w"]) + params["trunk_b"]
    mu = jnp.mean(h, axis=-1, keepdims=True)
    var = jnp.mean((h - mu) ** 2, axis=-1, keepdims=True)
    h = jnp.tanh((h - mu) * jax.lax.rsqrt(var + LN_EPS)
                 * params["ln_g"] + params["ln_b"])

    def head(n):
        z = (mm(h, params[f"{n}_w1h"]) + mm(action, params[f"{n}_w1a"])
             + params[f"{n}_b1"])
        z = jnp.maximum(z, 0.0)
        z = jnp.maximum(mm(z, params[f"{n}_w2"]) + params[f"{n}_b2"], 0.0)
        return mm(z, params[f"{n}_w3"]) + params[f"{n}_b3"]

    return head("q1"), head("q2")


if __name__ == "__main__":
    root_key = jax.random.PRNGKey(0)

    def run_case(case_idx, B, repr_dim, action_dim, feature_dim, hidden_dim):
        key = jax.random.fold_in(root_key, case_idx)
        k_obs, k_act, k_par = jax.random.split(key, 3)
        obs = jax.random.normal(k_obs, (B, repr_dim), jnp.float32)
        action = jax.random.uniform(k_act, (B, action_dim), jnp.float32, -1.0, 1.0)

        params = init_params(k_par, repr_dim, action_dim, feature_dim, hidden_dim)
        packed = pack_params(params, repr_dim, action_dim, feature_dim, hidden_dim)

        q1, q2 = critic_forward(obs, action, packed)
        q1 = jax.block_until_ready(q1)
        q2 = jax.block_until_ready(q2)

        r1, r2 = critic_ref(obs, action, params)
        assert q1.shape == (B, 1) and q2.shape == (B, 1)
        assert jnp.allclose(q1, r1, atol=5e-3, rtol=5e-3)
        assert jnp.allclose(q2, r2, atol=5e-3, rtol=5e-3)

    # Small shapes consistent with the module's forward; feature_dim=50 and
    # B=12 deliberately exercise lane/sublane padding + the masked LayerNorm.
    run_case(0, B=12, repr_dim=48, action_dim=6, feature_dim=50, hidden_dim=32)
    # Exercise the K-tiled trunk accumulator (nk > 1) and the in-kernel
    # pl.ds slicing of the VMEM-resident trunk weight.
    run_case(1, B=40, repr_dim=4224, action_dim=6, feature_dim=50, hidden_dim=64)

    print("KERNEL_OK")
</pallas_src>

<mosaic_0001>
module attributes {stable_mosaic.version = 11 : i64} {
  func.func @_critic_kernel(%arg0: i32, %arg1: i32, %arg2: memref<16x128xbf16, #tpu.memory_space<vmem>>, %arg3: memref<16x128xbf16, #tpu.memory_space<vmem>>, %arg4: memref<128x128xbf16, #tpu.memory_space<vmem>>, %arg5: memref<1x128xf32, #tpu.memory_space<vmem>>, %arg6: memref<1x128xf32, #tpu.memory_space<vmem>>, %arg7: memref<1x128xf32, #tpu.memory_space<vmem>>, %arg8: memref<128x256xbf16, #tpu.memory_space<vmem>>, %arg9: memref<128x256xbf16, #tpu.memory_space<vmem>>, %arg10: memref<1x256xf32, #tpu.memory_space<vmem>>, %arg11: memref<128x128xbf16, #tpu.memory_space<vmem>>, %arg12: memref<1x128xf32, #tpu.memory_space<vmem>>, %arg13: memref<128x128xbf16, #tpu.memory_space<vmem>>, %arg14: memref<1x128xf32, #tpu.memory_space<vmem>>, %arg15: memref<256x128xbf16, #tpu.memory_space<vmem>>, %arg16: memref<1x128xf32, #tpu.memory_space<vmem>>, %arg17: memref<16x128xf32, #tpu.memory_space<vmem>>, %arg18: memref<16x128xf32, #tpu.memory_space<vmem>>) attributes {dimension_semantics = [#tpu.dimension_semantics<parallel>, #tpu.dimension_semantics<arbitrary>], iteration_bounds = array<i64: 1, 1>, scalar_prefetch = 0 : i64, scratch_operands = 1 : i64, tpu.core_type = #tpu.core_type<tc>, window_params = [{transform_indices = @transform_0, window_bounds = array<i64: 16, 128>}, {transform_indices = @transform_1, window_bounds = array<i64: 16, 128>}, {pipeline_mode = #tpu.pipeline_mode<synchronous>, transform_indices = @transform_2, window_bounds = array<i64: 128, 128>}, {pipeline_mode = #tpu.pipeline_mode<synchronous>, transform_indices = @transform_3, window_bounds = array<i64: 1, 128>}, {pipeline_mode = #tpu.pipeline_mode<synchronous>, transform_indices = @transform_4, window_bounds = array<i64: 1, 128>}, {pipeline_mode = #tpu.pipeline_mode<synchronous>, transform_indices = @transform_5, window_bounds = array<i64: 1, 128>}, {pipeline_mode = #tpu.pipeline_mode<synchronous>, transform_indices = @transform_6, window_bounds = array<i64: 128, 256>}, {pipeline_mode = #tpu.pipeline_mode<synchronous>, transform_indices = @transform_7, window_bounds = array<i64: 128, 256>}, {pipeline_mode = #tpu.pipeline_mode<synchronous>, transform_indices = @transform_8, window_bounds = array<i64: 1, 256>}, {pipeline_mode = #tpu.pipeline_mode<synchronous>, transform_indices = @transform_9, window_bounds = array<i64: 128, 128>}, {pipeline_mode = #tpu.pipeline_mode<synchronous>, transform_indices = @transform_10, window_bounds = array<i64: 1, 128>}, {pipeline_mode = #tpu.pipeline_mode<synchronous>, transform_indices = @transform_11, window_bounds = array<i64: 128, 128>}, {pipeline_mode = #tpu.pipeline_mode<synchronous>, transform_indices = @transform_12, window_bounds = array<i64: 1, 128>}, {pipeline_mode = #tpu.pipeline_mode<synchronous>, transform_indices = @transform_13, window_bounds = array<i64: 256, 128>}, {pipeline_mode = #tpu.pipeline_mode<synchronous>, transform_indices = @transform_14, window_bounds = array<i64: 1, 128>}, {transform_indices = @transform_15, window_bounds = array<i64: 16, 128>}]} {
    %c0_i32 = arith.constant 0 : i32
    %0 = arith.cmpi eq, %arg1, %c0_i32 : i32
    %1 = arith.extui %0 : i1 to i32
    %c0_i32_0 = arith.constant 0 : i32
    %2 = arith.cmpi ne, %1, %c0_i32_0 : i32
    scf.if %2 {
      %cst_9 = arith.constant 0.000000e+00 : f32
      %15 = vector.broadcast %cst_9 : f32 to vector<16x128xf32>
      %c0_10 = arith.constant 0 : index
      %c0_11 = arith.constant 0 : index
      %16 = vector.load %arg18[%c0_10, %c0_11] : memref<16x128xf32, #tpu.memory_space<vmem>>, vector<16x128xf32>
      tpu.vector_store %arg18[%c0_10, %c0_11], %15 {strides = array<i32>} : memref<16x128xf32, #tpu.memory_space<vmem>>, vector<16x128xf32>,
    } else {
    }
    %c128_i32 = arith.constant 128 : i32
    %3 = arith.muli %arg1, %c128_i32 : i32
    %4 = tpu.assume_multiple %3, 128 : i32
    %5 = arith.index_cast %4 : i32 to index
    %c0 = arith.constant 0 : index
    %6 = vector.load %arg4[%5, %c0] : memref<128x128xbf16, #tpu.memory_space<vmem>>, vector<128x128xbf16>
    %c0_1 = arith.constant 0 : index
    %c0_2 = arith.constant 0 : index
    %7 = vector.load %arg18[%c0_1, %c0_2] : memref<16x128xf32, #tpu.memory_space<vmem>>, vector<16x128xf32>
    %c0_3 = arith.constant 0 : index
    %c0_4 = arith.constant 0 : index
    %8 = vector.load %arg2[%c0_3, %c0_4] : memref<16x128xbf16, #tpu.memory_space<vmem>>, vector<16x128xbf16>
    %cst = arith.constant dense<0.000000e+00> : vector<16x128xf32>
    %9 = tpu.matmul %8, %6, %cst {dimension_numbers = #tpu.dot_dimension_numbers<[1], [0], [0], [1], [0, 0, 1, 1], [], []>} : vector<16x128xbf16>, vector<128x128xbf16>, vector<16x128xf32> -> vector<16x128xf32>
    %10 = arith.addf %7, %9 : vector<16x128xf32>
    %c0_5 = arith.constant 0 : index
    %c0_6 = arith.constant 0 : index
    %11 = vector.load %arg18[%c0_5, %c0_6] : memref<16x128xf32, #tpu.memory_space<vmem>>, vector<16x128xf32>
    tpu.vector_store %arg18[%c0_5, %c0_6], %10 {strides = array<i32>} : memref<16x128xf32, #tpu.memory_space<vmem>>, vector<16x128xf32>,
    %c0_i32_7 = arith.constant 0 : i32
    %12 = arith.cmpi eq, %arg1, %c0_i32_7 : i32
    %13 = arith.extui %12 : i1 to i32
    %c0_i32_8 = arith.constant 0 : i32
    %14 = arith.cmpi ne, %13, %c0_i32_8 : i32
    scf.if %14 {
      %c0_9 = arith.constant 0 : index
      %c0_10 = arith.constant 0 : index
      %15 = vector.load %arg18[%c0_9, %c0_10] : memref<16x128xf32, #tpu.memory_space<vmem>>, vector<16x128xf32>
      %c0_11 = arith.constant 0 : index
      %c0_12 = arith.constant 0 : index
      %16 = vector.load %arg5[%c0_11, %c0_12] : memref<1x128xf32, #tpu.memory_space<vmem>>, vector<1x128xf32>
      %17 = vector.broadcast %16 : vector<1x128xf32> to vector<16x128xf32>
      %18 = arith.addf %15, %17 : vector<16x128xf32>
      %19 = tpu.iota {dimensions = array<i32: 1>} : vector<1x128xi32>
      %c50_i32 = arith.constant 50 : i32
      %20 = vector.broadcast %c50_i32 : i32 to vector<1x128xi32>
      %21 = arith.cmpi slt, %19, %20 : vector<1x128xi32>
      %22 = arith.extui %21 : vector<1x128xi1> to vector<1x128xi32>
      %23 = arith.sitofp %22 : vector<1x128xi32> to vector<1x128xf32>
      %cst_13 = arith.constant dense<0.000000e+00> : vector<16xf32>
      %24 = vector.multi_reduction <add>, %18, %cst_13 [1] : vector<16x128xf32> to vector<16xf32>
      %25 = vector.shape_cast %24 : vector<16xf32> to vector<16x1xf32>
      %cst_14 = arith.constant 2.000000e-02 : f32
      %26 = vector.broadcast %cst_14 : f32 to vector<16x1xf32>
      %27 = arith.mulf %25, %26 : vector<16x1xf32>
      %28 = vector.broadcast %27 : vector<16x1xf32> to vector<16x128xf32>
      %29 = arith.subf %18, %28 : vector<16x128xf32>
      %30 = vector.broadcast %23 : vector<1x128xf32> to vector<16x128xf32>
      %31 = arith.mulf %29, %30 : vector<16x128xf32>
      %32 = arith.mulf %31, %31 : vector<16x128xf32>
      %cst_15 = arith.constant dense<0.000000e+00> : vector<16xf32>
      %33 = vector.multi_reduction <add>, %32, %cst_15 [1] : vector<16x128xf32> to vector<16xf32>
      %34 = vector.shape_cast %33 : vector<16xf32> to vector<16x1xf32>
      %cst_16 = arith.constant 2.000000e-02 : f32
      %35 = vector.broadcast %cst_16 : f32 to vector<16x1xf32>
      %36 = arith.mulf %34, %35 : vector<16x1xf32>
      %cst_17 = arith.constant 9.99999974E-6 : f32
      %37 = vector.broadcast %cst_17 : f32 to vector<16x1xf32>
      %38 = arith.addf %36, %37 : vector<16x1xf32>
      %39 = math.rsqrt %38 : vector<16x1xf32>
      %40 = vector.broadcast %39 : vector<16x1xf32> to vector<16x128xf32>
      %41 = arith.mulf %31, %40 : vector<16x128xf32>
      %c0_18 = arith.constant 0 : index
      %c0_19 = arith.constant 0 : index
      %42 = vector.load %arg6[%c0_18, %c0_19] : memref<1x128xf32, #tpu.memory_space<vmem>>, vector<1x128xf32>
      %43 = vector.broadcast %42 : vector<1x128xf32> to vector<16x128xf32>
      %44 = arith.mulf %41, %43 : vector<16x128xf32>
      %c0_20 = arith.constant 0 : index
      %c0_21 = arith.constant 0 : index
      %45 = vector.load %arg7[%c0_20, %c0_21] : memref<1x128xf32, #tpu.memory_space<vmem>>, vector<1x128xf32>
      %46 = vector.broadcast %45 : vector<1x128xf32> to vector<16x128xf32>
      %47 = arith.addf %44, %46 : vector<16x128xf32>
      %48 = math.tanh %47 : vector<16x128xf32>
      %49 = arith.truncf %48 : vector<16x128xf32> to vector<16x128xbf16>
      %c0_22 = arith.constant 0 : index
      %c0_23 = arith.constant 0 : index
      %50 = vector.load %arg8[%c0_22, %c0_23] : memref<128x256xbf16, #tpu.memory_space<vmem>>, vector<128x256xbf16>
      %cst_24 = arith.constant dense<0.000000e+00> : vector<16x256xf32>
      %51 = tpu.matmul %49, %50, %cst_24 {dimension_numbers = #tpu.dot_dimension_numbers<[1], [0], [0], [1], [0, 0, 1, 1], [], []>} : vector<16x128xbf16>, vector<128x256xbf16>, vector<16x256xf32> -> vector<16x256xf32>
      %c0_25 = arith.constant 0 : index
      %c0_26 = arith.constant 0 : index
      %52 = vector.load %arg3[%c0_25, %c0_26] : memref<16x128xbf16, #tpu.memory_space<vmem>>, vector<16x128xbf16>
      %c0_27 = arith.constant 0 : index
      %c0_28 = arith.constant 0 : index
      %53 = vector.load %arg9[%c0_27, %c0_28] : memref<128x256xbf16, #tpu.memory_space<vmem>>, vector<128x256xbf16>
      %cst_29 = arith.constant dense<0.000000e+00> : vector<16x256xf32>
      %54 = tpu.matmul %52, %53, %cst_29 {dimension_numbers = #tpu.dot_dimension_numbers<[1], [0], [0], [1], [0, 0, 1, 1], [], []>} : vector<16x128xbf16>, vector<128x256xbf16>, vector<16x256xf32> -> vector<16x256xf32>
      %55 = arith.addf %51, %54 : vector<16x256xf32>
      %c0_30 = arith.constant 0 : index
      %c0_31 = arith.constant 0 : index
      %56 = vector.load %arg10[%c0_30, %c0_31] : memref<1x256xf32, #tpu.memory_space<vmem>>, vector<1x256xf32>
      %57 = vector.broadcast %56 : vector<1x256xf32> to vector<16x256xf32>
      %58 = arith.addf %55, %57 : vector<16x256xf32>
      %cst_32 = arith.constant 0.000000e+00 : f32
      %59 = vector.broadcast %cst_32 : f32 to vector<16x256xf32>
      %60 = arith.maximumf %58, %59 : vector<16x256xf32>
      %61 = arith.truncf %60 : vector<16x256xf32> to vector<16x256xbf16>
      %62 = vector.extract_strided_slice %61 {offsets = [0, 0], sizes = [16, 128], strides = [1, 1]} : vector<16x256xbf16> to vector<16x128xbf16>
      %63 = vector.extract_strided_slice %61 {offsets = [0, 128], sizes = [16, 128], strides = [1, 1]} : vector<16x256xbf16> to vector<16x128xbf16>
      %c0_33 = arith.constant 0 : index
      %c0_34 = arith.constant 0 : index
      %64 = vector.load %arg11[%c0_33, %c0_34] : memref<128x128xbf16, #tpu.memory_space<vmem>>, vector<128x128xbf16>
      %cst_35 = arith.constant dense<0.000000e+00> : vector<16x128xf32>
      %65 = tpu.matmul %62, %64, %cst_35 {dimension_numbers = #tpu.dot_dimension_numbers<[1], [0], [0], [1], [0, 0, 1, 1], [], []>} : vector<16x128xbf16>, vector<128x128xbf16>, vector<16x128xf32> -> vector<16x128xf32>
      %c0_36 = arith.constant 0 : index
      %c0_37 = arith.constant 0 : index
      %66 = vector.load %arg12[%c0_36, %c0_37] : memref<1x128xf32, #tpu.memory_space<vmem>>, vector<1x128xf32>
      %67 = vector.broadcast %66 : vector<1x128xf32> to vector<16x128xf32>
      %68 = arith.addf %65, %67 : vector<16x128xf32>
      %cst_38 = arith.constant 0.000000e+00 : f32
      %69 = vector.broadcast %cst_38 : f32 to vector<16x128xf32>
      %70 = arith.maximumf %68, %69 : vector<16x128xf32>
      %71 = arith.truncf %70 : vector<16x128xf32> to vector<16x128xbf16>
      %c0_39 = arith.constant 0 : index
      %c0_40 = arith.constant 0 : index
      %72 = vector.load %arg13[%c0_39, %c0_40] : memref<128x128xbf16, #tpu.memory_space<vmem>>, vector<128x128xbf16>
      %cst_41 = arith.constant dense<0.000000e+00> : vector<16x128xf32>
      %73 = tpu.matmul %63, %72, %cst_41 {dimension_numbers = #tpu.dot_dimension_numbers<[1], [0], [0], [1], [0, 0, 1, 1], [], []>} : vector<16x128xbf16>, vector<128x128xbf16>, vector<16x128xf32> -> vector<16x128xf32>
      %c0_42 = arith.constant 0 : index
      %c0_43 = arith.constant 0 : index
      %74 = vector.load %arg14[%c0_42, %c0_43] : memref<1x128xf32, #tpu.memory_space<vmem>>, vector<1x128xf32>
      %75 = vector.broadcast %74 : vector<1x128xf32> to vector<16x128xf32>
      %76 = arith.addf %73, %75 : vector<16x128xf32>
      %cst_44 = arith.constant 0.000000e+00 : f32
      %77 = vector.broadcast %cst_44 : f32 to vector<16x128xf32>
      %78 = arith.maximumf %76, %77 : vector<16x128xf32>
      %79 = arith.truncf %78 : vector<16x128xf32> to vector<16x128xbf16>
      %80 = tpu.concatenate %71, %79 in 1 : vector<16x128xbf16>, vector<16x128xbf16> -> vector<16x256xbf16>
      %c0_45 = arith.constant 0 : index
      %c0_46 = arith.constant 0 : index
      %81 = vector.load %arg15[%c0_45, %c0_46] : memref<256x128xbf16, #tpu.memory_space<vmem>>, vector<256x128xbf16>
      %cst_47 = arith.constant dense<0.000000e+00> : vector<16x128xf32>
      %82 = tpu.matmul %80, %81, %cst_47 {dimension_numbers = #tpu.dot_dimension_numbers<[1], [0], [0], [1], [0, 0, 1, 1], [], []>} : vector<16x256xbf16>, vector<256x128xbf16>, vector<16x128xf32> -> vector<16x128xf32>
      %c0_48 = arith.constant 0 : index
      %c0_49 = arith.constant 0 : index
      %83 = vector.load %arg16[%c0_48, %c0_49] : memref<1x128xf32, #tpu.memory_space<vmem>>, vector<1x128xf32>
      %84 = vector.broadcast %83 : vector<1x128xf32> to vector<16x128xf32>
      %85 = arith.addf %82, %84 : vector<16x128xf32>
      %c0_50 = arith.constant 0 : index
      %c0_51 = arith.constant 0 : index
      %86 = vector.load %arg17[%c0_50, %c0_51] : memref<16x128xf32, #tpu.memory_space<vmem>>, vector<16x128xf32>
      tpu.vector_store %arg17[%c0_50, %c0_51], %85 {strides = array<i32>} : memref<16x128xf32, #tpu.memory_space<vmem>>, vector<16x128xf32>,
    } else {
    }
    return
  }
  func.func @transform_0(%arg0: i32, %arg1: i32) -> (i32, i32) {
    %c0_i32 = arith.constant 0 : i32
    return %arg0, %arg1 : i32, i32
  }
  func.func @transform_1(%arg0: i32, %arg1: i32) -> (i32, i32) {
    %c0_i32 = arith.constant 0 : i32
    %c0_i32_0 = arith.constant 0 : i32
    return %arg0, %c0_i32 : i32, i32
  }
  func.func @transform_2(%arg0: i32, %arg1: i32) -> (i32, i32) {
    %c0_i32 = arith.constant 0 : i32
    %c0_i32_0 = arith.constant 0 : i32
    %c0_i32_1 = arith.constant 0 : i32
    return %c0_i32, %c0_i32_0 : i32, i32
  }
  func.func @transform_3(%arg0: i32, %arg1: i32) -> (i32, i32) {
    %c0_i32 = arith.constant 0 : i32
    %c0_i32_0 = arith.constant 0 : i32
    %c0_i32_1 = arith.constant 0 : i32
    return %c0_i32, %c0_i32_0 : i32, i32
  }
  func.func @transform_4(%arg0: i32, %arg1: i32) -> (i32, i32) {
    %c0_i32 = arith.constant 0 : i32
    %c0_i32_0 = arith.constant 0 : i32
    %c0_i32_1 = arith.constant 0 : i32
    return %c0_i32, %c0_i32_0 : i32, i32
  }
  func.func @transform_5(%arg0: i32, %arg1: i32) -> (i32, i32) {
    %c0_i32 = arith.constant 0 : i32
    %c0_i32_0 = arith.constant 0 : i32
    %c0_i32_1 = arith.constant 0 : i32
    return %c0_i32, %c0_i32_0 : i32, i32
  }
  func.func @transform_6(%arg0: i32, %arg1: i32) -> (i32, i32) {
    %c0_i32 = arith.constant 0 : i32
    %c0_i32_0 = arith.constant 0 : i32
    %c0_i32_1 = arith.constant 0 : i32
    return %c0_i32, %c0_i32_0 : i32, i32
  }
  func.func @transform_7(%arg0: i32, %arg1: i32) -> (i32, i32) {
    %c0_i32 = arith.constant 0 : i32
    %c0_i32_0 = arith.constant 0 : i32
    %c0_i32_1 = arith.constant 0 : i32
    return %c0_i32, %c0_i32_0 : i32, i32
  }
  func.func @transform_8(%arg0: i32, %arg1: i32) -> (i32, i32) {
    %c0_i32 = arith.constant 0 : i32
    %c0_i32_0 = arith.constant 0 : i32
    %c0_i32_1 = arith.constant 0 : i32
    return %c0_i32, %c0_i32_0 : i32, i32
  }
  func.func @transform_9(%arg0: i32, %arg1: i32) -> (i32, i32) {
    %c0_i32 = arith.constant 0 : i32
    %c0_i32_0 = arith.constant 0 : i32
    %c0_i32_1 = arith.constant 0 : i32
    return %c0_i32, %c0_i32_0 : i32, i32
  }
  func.func @transform_10(%arg0: i32, %arg1: i32) -> (i32, i32) {
    %c0_i32 = arith.constant 0 : i32
    %c0_i32_0 = arith.constant 0 : i32
    %c0_i32_1 = arith.constant 0 : i32
    return %c0_i32, %c0_i32_0 : i32, i32
  }
  func.func @transform_11(%arg0: i32, %arg1: i32) -> (i32, i32) {
    %c0_i32 = arith.constant 0 : i32
    %c0_i32_0 = arith.constant 0 : i32
    %c0_i32_1 = arith.constant 0 : i32
    return %c0_i32, %c0_i32_0 : i32, i32
  }
  func.func @transform_12(%arg0: i32, %arg1: i32) -> (i32, i32) {
    %c0_i32 = arith.constant 0 : i32
    %c0_i32_0 = arith.constant 0 : i32
    %c0_i32_1 = arith.constant 0 : i32
    return %c0_i32, %c0_i32_0 : i32, i32
  }
  func.func @transform_13(%arg0: i32, %arg1: i32) -> (i32, i32) {
    %c0_i32 = arith.constant 0 : i32
    %c0_i32_0 = arith.constant 0 : i32
    %c0_i32_1 = arith.constant 0 : i32
    return %c0_i32, %c0_i32_0 : i32, i32
  }
  func.func @transform_14(%arg0: i32, %arg1: i32) -> (i32, i32) {
    %c0_i32 = arith.constant 0 : i32
    %c0_i32_0 = arith.constant 0 : i32
    %c0_i32_1 = arith.constant 0 : i32
    return %c0_i32, %c0_i32_0 : i32, i32
  }
  func.func @transform_15(%arg0: i32, %arg1: i32) -> (i32, i32) {
    %c0_i32 = arith.constant 0 : i32
    %c0_i32_0 = arith.constant 0 : i32
    return %arg0, %c0_i32 : i32, i32
  }
}

</mosaic_0001>

<bundles_post_ra>
// kernel: tpu_custom_call.1
= control target key start
LH: loop header
LB: loop body
LE: loop exit
PB: predicated region body
PF: predicated region fallthrough
CT: control target
= control target key end

     0   :  { %20 = vsyncpa [#allocation4], 0  ;;  %s1850_s0 = inlined_call_operand.hbm [shape: bf16[16,128], index: 0, kind: input, shape index: {}]   ;;  %s1851_s1 = inlined_call_operand.hbm [shape: bf16[16,128], index: 1, kind: input, shape index: {}]   ;;  %s1852_s2 = inlined_call_operand.hbm [shape: bf16[128,128], index: 2, kind: input, shape index: {}]   ;;  %s1853_s3 = inlined_call_operand.vmem [shape: f32[1,128], index: 3, kind: input, shape index: {}]   ;;  %s1854_s4 = inlined_call_operand.hbm [shape: f32[1,128], index: 4, kind: input, shape index: {}]   ;;  %s1855_s5 = inlined_call_operand.vmem [shape: f32[1,128], index: 5, kind: input, shape index: {}]   ;;  %s1856_s6 = inlined_call_operand.hbm [shape: bf16[128,256], index: 6, kind: input, shape index: {}]   ;;  %s1857_s7 = inlined_call_operand.hbm [shape: bf16[128,256], index: 7, kind: input, shape index: {}]   ;;  %s1858_s8 = inlined_call_operand.vmem [shape: f32[1,256], index: 8, kind: input, shape index: {}]   ;;  %s1859_s9 = inlined_call_operand.hbm [shape: bf16[128,128], index: 9, kind: input, shape index: {}]   ;;  %s1860_s10 = inlined_call_operand.vmem [shape: f32[1,128], index: 10, kind: input, shape index: {}]   ;;  %s1861_s11 = inlined_call_operand.hbm [shape: bf16[128,128], index: 11, kind: input, shape index: {}]   ;;  %s1862_s12 = inlined_call_operand.vmem [shape: f32[1,128], index: 12, kind: input, shape index: {}]   ;;  %s1863_s13 = inlined_call_operand.hbm [shape: bf16[256,128], index: 13, kind: input, shape index: {}]   ;;  %s1864_s14 = inlined_call_operand.vmem [shape: f32[1,128], index: 14, kind: input, shape index: {}]   ;;  %s1865_s15 = inlined_call_operand.hbm [shape: f32[16,128], index: 15, kind: output, shape index: {}]  }
   0x1   :  { %21 = vsyncpa [#allocation7], 0 }
   0x2   :  { %22 = vsyncpa [#allocation10], 0 }
   0x3   :  { %23 = vsyncpa [#allocation13], 0 }
   0x4   :  { %24 = vsyncpa [#allocation16], 0 }
   0x5   :  { %25 = vsyncpa [#allocation5], 0  ;;  %s43_s20 = sshll.u32 %s1851_s1, 4  ;;  %s1670_s21 = smov [#allocation6]   ;;  %s44_s20 = int_to_ptr.hbm [resolvable:$true] %s43_s20 }
   0x6   :  { %s45_s22 = sshll.u32 %s1670_s21, 4  ;;  %s72_s25 = sshll.u32 %s1854_s4, 4  ;;  %s46_s22 = int_to_ptr.vmem [resolvable:$true] %s45_s22  ;;  %s73_s25 = int_to_ptr.hbm [resolvable:$true] %s72_s25 }
   0x7   :  { %s1671_s26 = smov 64   ;;  %s1672_s27 = smov 4  }
   0x8   :  { %51 = dma.hbm_to_vmem [thread:$0]  %s44_s20, 128, %s46_s22, [#allocation7], %s1671_s26, %s1671_s26, %s1672_s27  }
   0x9   :  { %s1673_s28 = smov [#allocation9]   ;;  %s97_s16 = sshll.u32 %s1857_s7, 4  ;;  %s98_s16 = int_to_ptr.hbm [resolvable:$true] %s97_s16 }
   0xa   :  { %s74_s29 = sshll.u32 %s1673_s28, 4  ;;  %s1674_s17 = smov [#allocation12]   ;;  %s75_s29 = int_to_ptr.vmem [resolvable:$true] %s74_s29 }
   0xb   :  { %77 = dma.hbm_to_vmem [thread:$0]  %s73_s25, 16, %s75_s29, [#allocation10]  }
   0xc   :  { %s99_s18 = sshll.u32 %s1674_s17, 4  ;;  %s127_s21 = sshll.u32 %s1861_s11, 4  ;;  %s100_s18 = int_to_ptr.vmem [resolvable:$true] %s99_s18  ;;  %s128_s21 = int_to_ptr.hbm [resolvable:$true] %s127_s21 }
   0xd   :  { %s1675_s23 = smov 128   ;;  %s1676_s24 = smov 8  }
   0xe   :  { %105 = dma.hbm_to_vmem [thread:$0]  %s98_s16, 2048, %s100_s18, [#allocation13], %s1675_s23, %s1675_s23, %s1676_s24  }
   0xf   :  { %s1677_s20 = smov [#allocation15]   ;;  %s30_s7 = sshll.u32 %s1850_s0, 4  ;;  %s31_s7 = int_to_ptr.hbm [resolvable:$true] %s30_s7 }
  0x10   :  { %s129_s22 = sshll.u32 %s1677_s20, 4  ;;  %s56_s1 = sshll.u32 %s1852_s2, 4  ;;  %s130_s22 = int_to_ptr.vmem [resolvable:$true] %s129_s22  ;;  %s57_s1 = int_to_ptr.hbm [resolvable:$true] %s56_s1 }
  0x11   :  { %135 = dma.hbm_to_vmem [thread:$0]  %s128_s21, 1024, %s130_s22, [#allocation16], %s1671_s26, %s1671_s26, %s1672_s27  }
  0x12   :  { %s1678_s30 = smov [#allocation3]   ;;  %s1679_s16 = smov [#allocation8]  }
  0x13   :  { %s32_s17 = sshll.u32 %s1678_s30, 4  ;;  %s58_s0 = sshll.u32 %s1679_s16, 4  ;;  %s33_s17 = int_to_ptr.vmem [resolvable:$true] %s32_s17  ;;  %s59_s0 = int_to_ptr.vmem [resolvable:$true] %s58_s0 }
  0x14   :  { %38 = dma.hbm_to_vmem [thread:$0]  %s31_s7, 128, %s33_s17, [#allocation4], %s1671_s26, %s1671_s26, %s1672_s27  }
  0x15   :  { %s84_s19 = sshll.u32 %s1856_s6, 4  ;;  %s112_s20 = sshll.u32 %s1859_s9, 4  ;;  %s85_s19 = int_to_ptr.hbm [resolvable:$true] %s84_s19  ;;  %s113_s20 = int_to_ptr.hbm [resolvable:$true] %s112_s20 }
  0x16   :  { %64 = dma.hbm_to_vmem [thread:$0]  %s57_s1, 1024, %s59_s0, [#allocation7], %s1671_s26, %s1671_s26, %s1672_s27  }
  0x17   :  { %s1680_s22 = smov [#allocation11]   ;;  %s1681_s28 = smov [#allocation14]  }
  0x18   :  { %s86_s25 = sshll.u32 %s1680_s22, 4  ;;  %s114_s6 = sshll.u32 %s1681_s28, 4  ;;  %s87_s25 = int_to_ptr.vmem [resolvable:$true] %s86_s25  ;;  %s115_s6 = int_to_ptr.vmem [resolvable:$true] %s114_s6 }
  0x19   :  { %92 = dma.hbm_to_vmem [thread:$0]  %s85_s19, 2048, %s87_s25, [#allocation10], %s1675_s23, %s1675_s23, %s1676_s24  }
  0x1a   :  { %s142_s29 = sshll.u32 %s1863_s13, 4  ;;  %s1682_s9 = smov [#allocation17]   ;;  %s143_s29 = int_to_ptr.hbm [resolvable:$true] %s142_s29 }
  0x1b   :  { %120 = dma.hbm_to_vmem [thread:$0]  %s113_s20, 1024, %s115_s6, [#allocation13], %s1671_s26, %s1671_s26, %s1672_s27  }
  0x1c   :  { %s144_s1 = sshll.u32 %s1682_s9, 4  ;;  %s145_s1 = int_to_ptr.vmem [resolvable:$true] %s144_s1 }
  0x1d   :  { %150 = dma.hbm_to_vmem [thread:$0]  %s143_s29, 2048, %s145_s1, [#allocation16], %s1671_s26, %s1671_s26, %s1672_s27  }
  0x1e   :  { %1658 = dma.done.wait [#allocation4], 128  }
  0x1f   :  { %1659 = vsyncadd [#allocation4], 4294967168 }
  0x20   :  { %1660 = dma.done.wait [#allocation7], 1152  }
  0x21   :  { %1661 = vsyncadd [#allocation7], 4294966144 }
  0x22   :  { %1662 = dma.done.wait [#allocation10], 2064  }
  0x23   :  { %1663 = vsyncadd [#allocation10], 4294965232 }
  0x24   :  { %1664 = dma.done.wait [#allocation13], 3072  }
  0x25   :  { %1665 = vsyncadd [#allocation13], 4294964224 }
  0x26   :  { %1666 = dma.done.wait [#allocation16], 3072  }
  0x27   :  { %1667 = vsyncadd [#allocation16], 4294964224  ;;  %v1322_v0 = vld [vmem:[#allocation8 + $0x38] sm:$0xff]  ;;  %v1321_v1 = vld [vmem:[#allocation8 + $0x30] sm:$0xff]  ;;  %v303_v14 = vlaneseq  ;;  %v1683_v18 = vmov 0.0   ;;  %s1684_s18 = smov [#allocation18]  }
  0x28   :  { %274 = vmatpush.bf16.msra.mxu0 %v1322_v0  ;;  %v1320_v2 = vld [vmem:[#allocation8 + $0x28] sm:$0xff]  ;;  %v1319_v3 = vld [vmem:[#allocation8 + $0x20] sm:$0xff]  ;;  %v1318_v4 = vld [vmem:[#allocation8 + $0x18] sm:$0xff]  ;;  %s997_s4 = sshll.u32 %s1684_s18, 4  ;;  %s999_s21 = sshll.u32 %s1865_s15, 4  ;;  %s998_s4 = int_to_ptr.vmem [resolvable:$true] %s997_s4  ;;  %s1000_s21 = int_to_ptr.hbm [resolvable:$true] %s999_s21 }
  0x29   :  { %v1317_v5 = vld [vmem:[#allocation8 + $0x10] sm:$0xff]  ;;  %v1316_v6 = vld [vmem:[#allocation8 + $0x8] sm:$0xff]  ;;  %v1315_v7 = vld [vmem:[#allocation8] sm:$0xff]  ;;  %v304_v15 = vand.u32 127, %v303_v14 }
  0x2a   :  { %v1323_v8 = vld [vmem:[#allocation3] sm:$0xff]  ;;  %v1119_v29 = vld [vmem:[#allocation12 + $0x78] sm:$0xf0]  ;;  %v1353_v31 = vld [vmem:[#allocation12 + $0x64] sm:$0xf] }
  0x2b   :  { %v1404_v9 = vld [vmem:[%s1853_s3] ss:$0 sm:$0xff]  ;;  %vm305_vm0 = vcmp.lt.s32.totalorder %v304_v15, 50  ;;  %v1355_v28 = vld [vmem:[#allocation12 + $0x74] sm:$0xf] }
  0x2c   :  { %275 = vmatpush.bf16.msra.mxu0 %v1321_v1  ;;  %v1054_v19 = vsel %vm305_vm0, 1.0, %v1683_v18  ;;  %v1122_v30 = vor.u32 %v1355_v28, %v1119_v29  ;;  %v1111_v32 = vld [vmem:[#allocation12 + $0x68] sm:$0xf0]  ;;  %v1117_v34 = vld [vmem:[#allocation12 + $0x70] sm:$0xf] }
  0x2d   :  { %v1114_v33 = vor.u32 %v1353_v31, %v1111_v32  ;;  %v1356_v35 = vld [vmem:[#allocation12 + $0x74] sm:$0xf0]  ;;  %v1351_v37 = vld [vmem:[#allocation12 + $0x54] sm:$0xf]  ;;  %v1103_v38 = vld [vmem:[#allocation12 + $0x58] sm:$0xf0] }
  0x2e   :  { %499 = vmatpush.bf16.msra.mxu2 %v1122_v30  ;;  %v1118_v36 = vor.u32 %v1356_v35, %v1117_v34  ;;  %v1181_v39 = vld [vmem:[#allocation11 + $0x70] sm:$0xf]  ;;  %v1106_v40 = vor.u32 %v1351_v37, %v1103_v38  ;;  %v1339_v41 = vld [vmem:[#allocation11 + $0x74] sm:$0xf0]  ;;  %v1338_v42 = vld [vmem:[#allocation11 + $0x74] sm:$0xf] }
  0x2f   :  { %v1183_v43 = vld [vmem:[#allocation11 + $0x78] sm:$0xf0]  ;;  %v1182_v44 = vor.u32 %v1339_v41, %v1181_v39  ;;  %v1109_v46 = vld [vmem:[#allocation12 + $0x60] sm:$0xf]  ;;  %v1354_v47 = vld [vmem:[#allocation12 + $0x64] sm:$0xf0] }
  0x30   :  { %276 = vmatpush.bf16.msra.mxu0 %v1320_v2  ;;  %485 = vmatpush.bf16.msra.mxu1 %v1118_v36  ;;  %v1186_v45 = vor.u32 %v1338_v42, %v1183_v43  ;;  %v1110_v48 = vor.u32 %v1354_v47, %v1109_v46  ;;  %v1349_v49 = vld [vmem:[#allocation12 + $0x44] sm:$0xf]  ;;  %v1095_v50 = vld [vmem:[#allocation12 + $0x48] sm:$0xf0]  ;;  %v1173_v51 = vld [vmem:[#allocation11 + $0x60] sm:$0xf] }
  0x31   :  { %593 = vmatpush.bf16.msra.mxu3 %v1182_v44  ;;  %v1098_v52 = vor.u32 %v1349_v49, %v1095_v50  ;;  %v1337_v53 = vld [vmem:[#allocation11 + $0x64] sm:$0xf0]  ;;  %v1336_v54 = vld [vmem:[#allocation11 + $0x64] sm:$0xf]  ;;  %v1175_v55 = vld [vmem:[#allocation11 + $0x68] sm:$0xf0] }
  0x32   :  { %500 = vmatpush.bf16.msra.mxu2 %v1114_v33  ;;  %v1174_v56 = vor.u32 %v1337_v53, %v1173_v51  ;;  %v1178_v57 = vor.u32 %v1336_v54, %v1175_v55  ;;  %v1101_v58 = vld [vmem:[#allocation12 + $0x50] sm:$0xf]  ;;  %v1352_v59 = vld [vmem:[#allocation12 + $0x54] sm:$0xf0]  ;;  %v1347_v61 = vld [vmem:[#allocation12 + $0x34] sm:$0xf] }
  0x33   :  { %v1102_v60 = vor.u32 %v1352_v59, %v1101_v58  ;;  %v1087_v62 = vld [vmem:[#allocation12 + $0x38] sm:$0xf0]  ;;  %v1165_v63 = vld [vmem:[#allocation11 + $0x50] sm:$0xf]  ;;  %v1335_v1 = vld [vmem:[#allocation11 + $0x54] sm:$0xf0] }
  0x34   :  { %277 = vmatpush.bf16.msra.mxu0 %v1319_v3  ;;  %486 = vmatpush.bf16.msra.mxu1 %v1110_v48  ;;  %v1090_v0 = vor.u32 %v1347_v61, %v1087_v62  ;;  %v1334_v2 = vld [vmem:[#allocation11 + $0x54] sm:$0xf]  ;;  %v1167_v3 = vld [vmem:[#allocation11 + $0x58] sm:$0xf0]  ;;  %v1332_v14 = vld [vmem:[#allocation11 + $0x44] sm:$0xf] }
  0x35   :  { %594 = vmatpush.bf16.msra.mxu3 %v1174_v56  ;;  %v1159_v15 = vld [vmem:[#allocation11 + $0x48] sm:$0xf0]  ;;  %v1085_v18 = vld [vmem:[#allocation12 + $0x30] sm:$0xf]  ;;  %v1330_v28 = vld [vmem:[#allocation11 + $0x34] sm:$0xf] }
  0x36   :  { %501 = vmatpush.bf16.msra.mxu2 %v1106_v40  ;;  %v1151_v29 = vld [vmem:[#allocation11 + $0x38] sm:$0xf0]  ;;  %v1077_v32 = vld [vmem:[#allocation12 + $0x20] sm:$0xf]  ;;  %v1346_v33 = vld [vmem:[#allocation12 + $0x24] sm:$0xf0] }
  0x37   :  { %v1154_v31 = vor.u32 %v1330_v28, %v1151_v29  ;;  %v1078_v34 = vor.u32 %v1346_v33, %v1077_v32  ;;  %v1341_v35 = vld [vmem:[#allocation12 + $0x4] sm:$0xf]  ;;  %v1063_v36 = vld [vmem:[#allocation12 + $0x8] sm:$0xf0]  ;;  %v1141_v37 = vld [vmem:[#allocation11 + $0x20] sm:$0xf] }
  0x38   :  { %278 = vmatpush.bf16.msra.mxu0 %v1318_v4  ;;  %487 = vmatpush.bf16.msra.mxu1 %v1102_v60  ;;  %v1166_v4 = vor.u32 %v1335_v1, %v1165_v63  ;;  %v1066_v39 = vor.u32 %v1341_v35, %v1063_v36  ;;  %v1329_v40 = vld [vmem:[#allocation11 + $0x24] sm:$0xf0]  ;;  %v1328_v41 = vld [vmem:[#allocation11 + $0x24] sm:$0xf]  ;;  %v1143_v42 = vld [vmem:[#allocation11 + $0x28] sm:$0xf0] }
  0x39   :  { %v1142_v44 = vor.u32 %v1329_v40, %v1141_v37  ;;  %v1069_v46 = vld [vmem:[#allocation12 + $0x10] sm:$0xf]  ;;  %v1344_v47 = vld [vmem:[#allocation12 + $0x14] sm:$0xf0]  ;;  %v1326_v53 = vld [vmem:[#allocation11 + $0x14] sm:$0xf] }
  0x3a   :  { %502 = vmatpush.bf16.msra.mxu2 %v1098_v52  ;;  %595 = vmatpush.bf16.msra.mxu3 %v1166_v4  ;;  %v1070_v48 = vor.u32 %v1344_v47, %v1069_v46  ;;  %v1340_v49 = vld [vmem:[#allocation6] sm:$0xff]  ;;  %v1133_v50 = vld [vmem:[#allocation11 + $0x10] sm:$0xf]  ;;  %v1342_v58 = vld [vmem:[#allocation12 + $0x4] sm:$0xf0] }
  0x3b   :  { %v1327_v51 = vld [vmem:[#allocation11 + $0x14] sm:$0xf0]  ;;  %v1135_v54 = vld [vmem:[#allocation11 + $0x18] sm:$0xf0]  ;;  %v1125_v59 = vld [vmem:[#allocation11] sm:$0xf] }
  0x3c   :  { %279 = vmatpush.bf16.msra.mxu0 %v1317_v5  ;;  %v1170_v5 = vor.u32 %v1334_v2, %v1167_v3  ;;  %v1134_v55 = vor.u32 %v1327_v51, %v1133_v50  ;;  %v1138_v56 = vor.u32 %v1326_v53, %v1135_v54  ;;  %v1325_v61 = vld [vmem:[#allocation11 + $0x4] sm:$0xf0]  ;;  %v1324_v62 = vld [vmem:[#allocation11 + $0x4] sm:$0xf]  ;;  %v1127_v63 = vld [vmem:[#allocation11 + $0x8] sm:$0xf0] }
  0x3d   :  { %v1126_v1 = vor.u32 %v1325_v61, %v1125_v59  ;;  %v1130_v2 = vor.u32 %v1324_v62, %v1127_v63  ;;  %v1363_v33 = vld [vmem:[#allocation14 + $0x30] sm:$0xff]  ;;  %v1362_v35 = vld [vmem:[#allocation14 + $0x28] sm:$0xff]  ;;  %v1361_v37 = vld [vmem:[#allocation14 + $0x20] sm:$0xff] }
  0x3e   :  { %503 = vmatpush.bf16.msra.mxu2 %v1090_v0  ;;  %v1370_v36 = vld [vmem:[#allocation15 + $0x28] sm:$0xff]  ;;  %v1359_v40 = vld [vmem:[#allocation14 + $0x10] sm:$0xff]  ;;  %v1380_v46 = vld [vmem:[#allocation17 + $0x38] sm:$0xff] }
  0x3f   :  { %v1388_v47 = vld [vmem:[#allocation17 + $0x78] sm:$0xff]  ;;  %v621_v54 = vld [vmem:[%s1858_s8] sm:$0x3] }
  0x40   :  { %280 = vmatpush.bf16.msra.mxu0 %v1316_v6  ;;  %v1093_v6 = vld [vmem:[#allocation12 + $0x40] sm:$0xf] }
  0x44   :  { %281 = vmatpush.bf16.msra.mxu0 %v1315_v7  ;;  %v1350_v7 = vld [vmem:[#allocation12 + $0x44] sm:$0xf0] }
  0x47   :  { %282 = vmatmul.bf16.vlgmr.msra.gmra.mxu0 %v1323_v8  ;;  %v1094_v8 = vor.u32 %v1350_v7, %v1093_v6 }
  0x48   :  { %607 = vmatpush.bf16.msrb.mxu0 %v1186_v45  ;;  %v1146_v45 = vor.u32 %v1328_v41, %v1143_v42  ;;  %v1367_v41 = vld [vmem:[#allocation15 + $0x10] sm:$0xff]  ;;  %v1358_v42 = vld [vmem:[#allocation14 + $0x8] sm:$0xff] }
  0x49   :  { %488 = vmatpush.bf16.msra.mxu1 %v1094_v8  ;;  %v1364_v8 = vld [vmem:[#allocation14 + $0x38] sm:$0xff] }
  0x4c   :  { %608 = vmatpush.bf16.msrb.mxu0 %v1178_v57  ;;  %v1061_v57 = vld [vmem:[#allocation12] sm:$0xf] }
  0x4d   :  { %v1062_v60 = vor.u32 %v1342_v58, %v1061_v57  ;;  %v623_v57 = vperm.slane %v621_v54, 0 }
  0x50   :  { %609 = vmatpush.bf16.msrb.mxu0 %v1170_v5 }
  0xc4   :  { %v283_v10 = vpop.f32.mrf.mxu0 }
  0xc5   :  { %v301_v11 = vadd.f32 %v1404_v9, %v283_v10  ;;  %v1079_v10 = vld [vmem:[#allocation12 + $0x28] sm:$0xf0] }
  0xc7   :  { %308 = vadd.xlane.f32.xlu0 %v301_v11 }
  0xcc   :  { %v285_v12 = vpop.f32.mrf.mxu0 }
  0xcd   :  { %v302_v13 = vadd.f32 %v1404_v9, %v285_v12  ;;  %v1345_v9 = vld [vmem:[#allocation12 + $0x24] sm:$0xf] }
  0xce   :  { %v1082_v12 = vor.u32 %v1345_v9, %v1079_v10  ;;  %v1372_v9 = vld [vmem:[#allocation15 + $0x38] sm:$0xff] }
  0xcf   :  { %310 = vadd.xlane.f32.xlu0 %v302_v13 }
  0xd0   :  { %504 = vmatpush.bf16.msra.mxu2 %v1082_v12 }
 0x13a   :  { %v309_v16 = vpop.xlane.xlu0 %308 }
 0x13b   :  { %v312_v17 = vmul.f32 0.02, %v309_v16 }
 0x13d   :  { %v314_v20 = vsub.f32 %v301_v11, %v312_v17  ;;  %v1157_v11 = vld [vmem:[#allocation11 + $0x40] sm:$0xf]  ;;  %v1162_v17 = vor.u32 %v1332_v14, %v1159_v15 }
 0x13f   :  { %v1819_v21 = vmul.f32 %v1054_v19, %v314_v20  ;;  %610 = vmatpush.bf16.msrb.mxu0 %v1162_v17 }
 0x141   :  { %v318_v22 = vmul.f32 %v1819_v21, %v1819_v21 }
 0x142   :  { %v311_v23 = vpop.xlane.xlu0 %310 }
 0x143   :  { %v313_v24 = vmul.f32 0.02, %v311_v23  ;;  %320 = vadd.xlane.f32.xlu1 %v318_v22  ;;  %v1343_v22 = vld [vmem:[#allocation12 + $0x14] sm:$0xf]  ;;  %v1071_v23 = vld [vmem:[#allocation12 + $0x18] sm:$0xf0]  ;;  %611 = vmatpush.bf16.msrb.mxu0 %v1154_v31 }
 0x145   :  { %v315_v25 = vsub.f32 %v302_v13, %v313_v24  ;;  %v1333_v13 = vld [vmem:[#allocation11 + $0x44] sm:$0xf0]  ;;  %v1149_v24 = vld [vmem:[#allocation11 + $0x30] sm:$0xf] }
 0x146   :  { %v1158_v16 = vor.u32 %v1333_v13, %v1157_v11 }
 0x147   :  { %v1823_v26 = vmul.f32 %v1054_v19, %v315_v25  ;;  %v1348_v19 = vld [vmem:[#allocation12 + $0x34] sm:$0xf0]  ;;  %v1074_v25 = vor.u32 %v1343_v22, %v1071_v23  ;;  %612 = vmatpush.bf16.msrb.mxu0 %v1146_v45  ;;  %v1365_v45 = vld [vmem:[#allocation15] sm:$0xff] }
 0x148   :  { %v1086_v20 = vor.u32 %v1348_v19, %v1085_v18  ;;  %596 = vmatpush.bf16.msra.mxu3 %v1158_v16  ;;  %v1405_v19 = vld [vmem:[#allocation9] ss:$0 sm:$0xff] }
 0x149   :  { %v319_v27 = vmul.f32 %v1823_v26, %v1823_v26  ;;  %505 = vmatpush.bf16.msra.mxu2 %v1074_v25 }
 0x14a   :  { %489 = vmatpush.bf16.msra.mxu1 %v1086_v20 }
 0x14b   :  { %322 = vadd.xlane.f32.xlu1 %v319_v27  ;;  %v1331_v27 = vld [vmem:[#allocation11 + $0x34] sm:$0xf0]  ;;  %613 = vmatpush.bf16.msrb.mxu0 %v1138_v56 }
 0x14c   :  { %v1150_v30 = vor.u32 %v1331_v27, %v1149_v24  ;;  %v1406_v24 = vld [vmem:[%s1855_s5] ss:$0 sm:$0xff] }
 0x14d   :  { %506 = vmatpush.bf16.msra.mxu2 %v1066_v39  ;;  %v1368_v39 = vld [vmem:[#allocation15 + $0x18] sm:$0xff] }
 0x14e   :  { %597 = vmatpush.bf16.msra.mxu3 %v1150_v30  ;;  %490 = vmatpush.bf16.msra.mxu1 %v1078_v34  ;;  %v1371_v34 = vld [vmem:[#allocation15 + $0x30] sm:$0xff] }
 0x14f   :  { %614 = vmatpush.bf16.msrb.mxu0 %v1130_v2 }
 0x150   :  { %507 = vmatmul.bf16.vlgmr.msra.gmra.mxu2 %v1340_v49 }
 0x151   :  { %801 = vmatpush.bf16.msrb.mxu2 %v1372_v9 }
 0x152   :  { %598 = vmatpush.bf16.msra.mxu3 %v1142_v44  ;;  %491 = vmatpush.bf16.msra.mxu1 %v1070_v48  ;;  %v1357_v44 = vld [vmem:[#allocation14] sm:$0xff]  ;;  %v1379_v48 = vld [vmem:[#allocation17 + $0x30] sm:$0xff] }
 0x153   :  { %977 = vmatpush.bf16.msra.mxu0 %v1388_v47 }
 0x155   :  { %802 = vmatpush.bf16.msrb.mxu2 %v1371_v34 }
 0x156   :  { %599 = vmatpush.bf16.msra.mxu3 %v1134_v55  ;;  %492 = vmatpush.bf16.msra.mxu1 %v1062_v60  ;;  %v624_v60 = vperm.slane %v621_v54, 1 }
 0x159   :  { %493 = vmatmul.bf16.vlgmr.msra.gmra.mxu1 %v1340_v49  ;;  %803 = vmatpush.bf16.msrb.mxu2 %v1370_v36  ;;  %v1387_v49 = vld [vmem:[#allocation17 + $0x70] sm:$0xff] }
 0x15a   :  { %600 = vmatpush.bf16.msra.mxu3 %v1126_v1  ;;  %711 = vmatpush.bf16.msrb.mxu1 %v1364_v8 }
 0x15b   :  { %978 = vmatpush.bf16.msra.mxu0 %v1387_v49 }
 0x15e   :  { %712 = vmatpush.bf16.msrb.mxu1 %v1363_v33  ;;  %963 = vmatpush.bf16.msrb.mxu3 %v1380_v46  ;;  %v1408_v33 = vld [vmem:[%s1862_s12] ss:$0 sm:$0xff] }
 0x162   :  { %713 = vmatpush.bf16.msrb.mxu1 %v1362_v35  ;;  %964 = vmatpush.bf16.msrb.mxu3 %v1379_v48 }
 0x166   :  { %714 = vmatpush.bf16.msrb.mxu1 %v1361_v37 }
 0x1b6   :  { %v321_v38 = vpop.xlane.xlu1 %320 }
 0x1b7   :  { %v324_v43 = vmul.f32 0.02, %v321_v38  ;;  %v1360_v38 = vld [vmem:[#allocation14 + $0x18] sm:$0xff] }
 0x1b8   :  { %715 = vmatpush.bf16.msrb.mxu1 %v1360_v38 }
 0x1b9   :  { %v326_v52 = vadd.f32 1e-05, %v324_v43  ;;  %v1366_v43 = vld [vmem:[#allocation15 + $0x8] sm:$0xff] }
 0x1bb   :  { %1410 = vrsqrt.f32 %v326_v52  ;;  %vm334_vm2 = vweird.f32 %v326_v52 }
 0x1bc   :  { %716 = vmatpush.bf16.msrb.mxu1 %v1359_v40 }
 0x1be   :  { %v323_v0 = vpop.xlane.xlu1 %322 }
 0x1bf   :  { %v325_v3 = vmul.f32 0.02, %v323_v0 }
 0x1c0   :  { %717 = vmatpush.bf16.msrb.mxu1 %v1358_v42 }
 0x1c1   :  { %v1411_v4 = vpop.eup %1410  ;;  %v327_v5 = vadd.f32 1e-05, %v325_v3 }
 0x1c2   :  { %v329_v6 = vmul.f32 %v1411_v4, %v326_v52  ;;  %vm335_vm1 = vweird.f32 %v1411_v4  ;;  %v1378_v52 = vld [vmem:[#allocation17 + $0x28] sm:$0xff] }
 0x1c3   :  { %1412 = vrsqrt.f32 %v327_v5  ;;  %vm336_vm3 = vmor %vm334_vm2, %vm335_vm1  ;;  %vm344_vm5 = vweird.f32 %v327_v5  ;;  %965 = vmatpush.bf16.msrb.mxu3 %v1378_v52 }
 0x1c4   :  { %v330_v7 = vmul.f32 %v1411_v4, %v329_v6  ;;  %718 = vmatpush.bf16.msrb.mxu1 %v1357_v44 }
 0x1c6   :  { %v331_v10 = vmul.f32 0.5, %v330_v7 }
 0x1c8   :  { %v332_v11 = vsub.f32 1.5, %v331_v10 }
 0x1c9   :  { %v1413_v12 = vpop.eup %1412 }
 0x1ca   :  { %v333_v13 = vmul.f32 %v1411_v4, %v332_v11  ;;  %v339_v14 = vmul.f32 %v1413_v12, %v327_v5  ;;  %vm345_vm4 = vweird.f32 %v1413_v12 }
 0x1cb   :  { %vm346_vm6 = vmor %vm344_vm5, %vm345_vm4 }
 0x1cc   :  { %v337_v15 = vsel %vm336_vm3, %v1411_v4, %v333_v13  ;;  %v340_v16 = vmul.f32 %v1413_v12, %v339_v14 }
 0x1cd   :  { %v348_v17 = vmul.f32 %v337_v15, %v1819_v21 }
 0x1ce   :  { %v341_v18 = vmul.f32 0.5, %v340_v16 }
 0x1cf   :  { %v354_v23 = vmul.f32 %v1405_v19, %v348_v17 }
 0x1d0   :  { %v342_v20 = vsub.f32 1.5, %v341_v18  ;;  %v1377_v18 = vld [vmem:[#allocation17 + $0x20] sm:$0xff] }
 0x1d1   :  { %v360_v28 = vadd.f32 %v1406_v24, %v354_v23  ;;  %966 = vmatpush.bf16.msrb.mxu3 %v1377_v18  ;;  %v1375_v23 = vld [vmem:[#allocation17 + $0x10] sm:$0xff] }
 0x1d2   :  { %v343_v22 = vmul.f32 %v1413_v12, %v342_v20  ;;  %v1376_v20 = vld [vmem:[#allocation17 + $0x18] sm:$0xff] }
 0x1d3   :  { %1414 = vtanh.f32 %v360_v28  ;;  %v508_v50 = vpop.f32.mrf.mxu2  ;;  %v1373_v28 = vld [vmem:[#allocation17] sm:$0xff] }
 0x1d4   :  { %v347_v25 = vsel %vm346_vm6, %v1413_v12, %v343_v22  ;;  %v1385_v22 = vld [vmem:[#allocation17 + $0x60] sm:$0xff] }
 0x1d5   :  { %v349_v27 = vmul.f32 %v347_v25, %v1823_v26  ;;  %v1369_v26 = vld [vmem:[#allocation15 + $0x20] sm:$0xff]  ;;  %967 = vmatpush.bf16.msrb.mxu3 %v1376_v20  ;;  %v1374_v25 = vld [vmem:[#allocation17 + $0x8] sm:$0xff] }
 0x1d6   :  { %804 = vmatpush.bf16.msrb.mxu2 %v1369_v26  ;;  %v494_v53 = vpop.f32.mrf.mxu1 }
 0x1d7   :  { %v355_v29 = vmul.f32 %v1405_v19, %v349_v27  ;;  %v1386_v19 = vld [vmem:[#allocation17 + $0x68] sm:$0xff]  ;;  %v1383_v27 = vld [vmem:[#allocation17 + $0x50] sm:$0xff] }
 0x1d8   :  { %979 = vmatpush.bf16.msra.mxu0 %v1386_v19 }
 0x1d9   :  { %v361_v30 = vadd.f32 %v1406_v24, %v355_v29  ;;  %v1415_v21 = vpop.eup %1414  ;;  %968 = vmatpush.bf16.msrb.mxu3 %v1375_v23  ;;  %v1384_v24 = vld [vmem:[#allocation17 + $0x58] sm:$0xff]  ;;  %v1382_v29 = vld [vmem:[#allocation17 + $0x48] sm:$0xff] }
 0x1da   :  { %805 = vmatpush.bf16.msrb.mxu2 %v1368_v39 }
 0x1db   :  { %1416 = vtanh.f32 %v361_v30  ;;  %v510_v61 = vpop.f32.mrf.mxu2  ;;  %v1381_v30 = vld [vmem:[#allocation17 + $0x40] sm:$0xff] }
 0x1dc   :  { %980 = vmatpush.bf16.msra.mxu0 %v1385_v22 }
 0x1dd   :  { %969 = vmatpush.bf16.msrb.mxu3 %v1374_v25 }
 0x1de   :  { %806 = vmatpush.bf16.msrb.mxu2 %v1367_v41  ;;  %v496_v1 = vpop.f32.mrf.mxu1 }
 0x1e0   :  { %981 = vmatpush.bf16.msra.mxu0 %v1384_v24 }
 0x1e1   :  { %v1417_v31 = vpop.eup %1416  ;;  %970 = vmatpush.bf16.msrb.mxu3 %v1373_v28 }
 0x1e2   :  { %v364_v32 = vpack.c.bf16 %v1417_v31, %v1415_v21  ;;  %807 = vmatpush.bf16.msrb.mxu2 %v1366_v43  ;;  %v1407_v21 = vld [vmem:[%s1860_s10] ss:$0 sm:$0xff] }
 0x1e4   :  { %601 = vmatmul.bf16.vlgmr.msra.gmra.mxu3 %v364_v32  ;;  %615 = vmatmul.bf16.vlgmr.msrb.gmra.mxu0 %v364_v32 }
 0x1e5   :  { %982 = vmatpush.bf16.msra.mxu0 %v1383_v27 }
 0x1e6   :  { %808 = vmatpush.bf16.msrb.mxu2 %v1365_v45 }
 0x1e9   :  { %983 = vmatpush.bf16.msra.mxu0 %v1382_v29 }
 0x1ed   :  { %984 = vmatpush.bf16.msra.mxu0 %v1381_v30 }
 0x261   :  { %v616_v51 = vpop.f32.mrf.mxu0 }
 0x262   :  { %v617_v59 = vadd.f32 %v616_v51, %v508_v50 }
 0x264   :  { %v628_v0 = vadd.f32 %v624_v60, %v617_v59 }
 0x266   :  { %v632_v6 = vmax.f32 %v628_v0, 0.0 }
 0x267   :  { %v602_v55 = vpop.f32.mrf.mxu3 }
 0x268   :  { %v603_v56 = vadd.f32 %v602_v55, %v494_v53  ;;  %v1409_v53 = vld [vmem:[%s1864_s14] ss:$0 sm:$0xff] }
 0x269   :  { %v618_v58 = vpop.f32.mrf.mxu0 }
 0x26a   :  { %v627_v62 = vadd.f32 %v623_v57, %v603_v56  ;;  %v619_v63 = vadd.f32 %v618_v58, %v510_v61 }
 0x26c   :  { %v631_v3 = vmax.f32 %v627_v62, 0.0  ;;  %v630_v4 = vadd.f32 %v624_v60, %v619_v63 }
 0x26e   :  { %v635_v8 = vpack.c.bf16 %v632_v6, %v631_v3  ;;  %v634_v9 = vmax.f32 %v630_v4, 0.0 }
 0x26f   :  { %v604_v2 = vpop.f32.mrf.mxu3 }
 0x270   :  { %v605_v5 = vadd.f32 %v604_v2, %v496_v1  ;;  %v659_v12 = vunpack.c.l.b16 %v635_v8  ;;  %v749_v14 = vunpack.c.h.b16 %v635_v8 }
 0x272   :  { %v629_v7 = vadd.f32 %v623_v57, %v605_v5 }
 0x274   :  { %v633_v10 = vmax.f32 %v629_v7, 0.0 }
 0x276   :  { %v636_v11 = vpack.c.bf16 %v634_v9, %v633_v10 }
 0x278   :  { %v660_v13 = vunpack.c.l.b16 %v636_v11  ;;  %v750_v15 = vunpack.c.h.b16 %v636_v11 }
 0x27a   :  { %v661_v16 = vpack.c.b16 %v660_v13, %v659_v12  ;;  %v751_v17 = vpack.c.b16 %v750_v15, %v749_v14 }
 0x27c   :  { %719 = vmatmul.bf16.vlgmr.msrb.gmra.mxu1 %v661_v16  ;;  %809 = vmatmul.bf16.vlgmr.msrb.gmra.mxu2 %v751_v17 }
 0x2f9   :  { %v720_v31 = vpop.f32.mrf.mxu1 }
 0x2fa   :  { %v721_v32 = vadd.f32 %v1407_v21, %v720_v31 }
 0x2fc   :  { %v725_v35 = vmax.f32 %v721_v32, 0.0 }
 0x2fe   :  { %v727_v38 = vpack.c.bf16 %v725_v35, %v725_v35 }
 0x2ff   :  { %v810_v34 = vpop.f32.mrf.mxu2 }
 0x300   :  { %v811_v37 = vadd.f32 %v1408_v33, %v810_v34  ;;  %v821_v43 = vunpack.c.l.b16 %v727_v38 }
 0x301   :  { %v722_v36 = vpop.f32.mrf.mxu1 }
 0x302   :  { %v723_v26 = vadd.f32 %v1407_v21, %v722_v36  ;;  %v815_v40 = vmax.f32 %v811_v37, 0.0 }
 0x304   :  { %v726_v39 = vmax.f32 %v723_v26, 0.0  ;;  %v817_v46 = vpack.c.bf16 %v815_v40, %v815_v40 }
 0x306   :  { %v728_v41 = vpack.c.bf16 %v726_v39, %v726_v39  ;;  %v827_v50 = vunpack.c.l.b16 %v817_v46 }
 0x307   :  { %v812_v42 = vpop.f32.mrf.mxu2 }
 0x308   :  { %v822_v44 = vunpack.c.l.b16 %v728_v41  ;;  %v813_v45 = vadd.f32 %v1408_v33, %v812_v42 }
 0x30a   :  { %v816_v47 = vmax.f32 %v813_v45, 0.0  ;;  %v823_v48 = vpack.c.b16 %v822_v44, %v821_v43 }
 0x30c   :  { %v818_v49 = vpack.c.bf16 %v816_v47, %v816_v47  ;;  %971 = vmatmul.bf16.vlgmr.msrb.gmra.mxu3 %v823_v48 }
 0x30e   :  { %v828_v51 = vunpack.c.l.b16 %v818_v49 }
 0x310   :  { %v829_v52 = vpack.c.b16 %v828_v51, %v827_v50 }
 0x312   :  { %985 = vmatmul.bf16.vlgmr.msra.gmra.mxu0 %v829_v52 }
 0x38f   :  { %v972_v54 = vpop.f32.mrf.mxu3  ;;  %v986_v55 = vpop.f32.mrf.mxu0 }
 0x390   :  { %v973_v56 = vadd.f32 %v1409_v53, %v972_v54 }
 0x392   :  { %v987_v57 = vadd.f32 %v986_v55, %v973_v56 }
 0x394   :  { %991 = vst [vmem:[#allocation18] sm:$0xff] %v987_v57 }
 0x397   :  { %v974_v58 = vpop.f32.mrf.mxu3  ;;  %v988_v60 = vpop.f32.mrf.mxu0 }
 0x398   :  { %v975_v59 = vadd.f32 %v1409_v53, %v974_v58 }
 0x39a   :  { %v989_v61 = vadd.f32 %v988_v60, %v975_v59 }
 0x39c   :  { %992 = vst [vmem:[#allocation18 + $0x8] sm:$0xff] %v989_v61 }
 0x39d   :  { %1005 = dma.vmem_to_hbm [thread:$0]  %s998_s4, 256, %s1000_s21, [#allocation5], %s1675_s23, %s1675_s23, %s1676_s24  }
 0x39e   :  { %1668 = dma.done.wait [#allocation5], 256  }
 0x39f   :  { %1669 = vsyncadd [#allocation5], 4294967040 }
 0x3a0   :  { %1010 = vsyncpa [#allocation4], 1 }
 0x3a1   :  { %1011 = vsyncpa [#allocation7], 1 }
 0x3a2   :  { %1012 = vsyncpa [#allocation10], 1 }
 0x3a3   :  { %1013 = vsyncpa [#allocation13], 1 }
 0x3a4   :  { %1014 = vsyncpa [#allocation16], 1 }
 0x3a5   :  { %1015 = vsyncpa [#allocation5], 1 }

</bundles_post_ra>
